<compile_context>
chip_gen: v6e
topology: v6e:2x2x1
jax: 0.10.0
libtpu: 0.0.40
codegen_flags: <defaults>
</compile_context>

<pallas_src>
import functools

import jax
import jax.numpy as jnp
import numpy as np
from jax import lax
from jax.experimental import pallas as pl
from jax.experimental.pallas import tpu as pltpu


# ------------------------------ fused kernel --------------------------------

def _fused_cross_attention_kernel(x_ref, ctx_ref, wq_ref, wk_ref, wv_ref, wo_ref, bo_ref,
                                  o_ref, *, heads, scale):
    """One grid step == one batch-block.  Everything stays in VMEM.

    x_ref:   (bb, N, Dq)       queries block
    ctx_ref: (bb, M, Dq)       context block
    wq/wk/wv_ref: (heads, Dq, d)   head-major projection weights (resident)
    wo_ref:  (heads, d, Dq)        head-major output projection (resident)
    bo_ref:  (1, Dq) f32           output bias (resident)
    o_ref:   (bb, N, Dq)
    """
    bb, n, dq = x_ref.shape
    m = ctx_ref.shape[1]
    cdt = x_ref.dtype                     # compute dtype for MXU operands

    wq = wq_ref[...]
    wk = wk_ref[...]
    wv = wv_ref[...]
    wo = wo_ref[...]
    bo = bo_ref[...]                      # (1, Dq) f32

    # leading-batch dot_general dimension numbers (batch axis = heads)
    dn_proj = (((2,), (1,)), ((0,), (0,)))   # (h,s,Dq) x (h,Dq,d) -> (h,s,d)
    dn_qk   = (((2,), (2,)), ((0,), (0,)))   # (h,N,d)  x (h,M,d)  -> (h,N,M)
    dn_pv   = (((2,), (1,)), ((0,), (0,)))   # (h,N,M)  x (h,M,d)  -> (h,N,d)
    dn_out  = (((2,), (1,)), ((0,), (0,)))   # (h,N,d)  x (h,d,Dq) -> (h,N,Dq)

    # static B loop in-kernel (review: collapse the batch grid on single-TC parts)
    for b in range(bb):
        xb = jnp.broadcast_to(x_ref[b], (heads, n, dq))    # replicate along untiled axis
        cb = jnp.broadcast_to(ctx_ref[b], (heads, m, dq))

        # --- head-batched projections (MXU, f32 accumulation) ---
        q = lax.dot_general(xb, wq, dn_proj, preferred_element_type=jnp.float32)
        k = lax.dot_general(cb, wk, dn_proj, preferred_element_type=jnp.float32)
        v = lax.dot_general(cb, wv, dn_proj, preferred_element_type=jnp.float32)

        # scale q (heads*N*d multiplies) instead of sim (heads*N*M multiplies)
        q = (q * scale).astype(cdt)
        k = k.astype(cdt)
        v = v.astype(cdt)

        # --- attention, all heads in one batched dot stream ---
        sim = lax.dot_general(q, k, dn_qk, preferred_element_type=jnp.float32)  # (h,N,M) f32
        mx = jnp.max(sim, axis=-1, keepdims=True)
        p = jnp.exp(sim - mx)
        denom = jnp.sum(p, axis=-1, keepdims=True)
        attn = p * pl.reciprocal(denom, approx=True)        # softmax (f32), EUP reciprocal
        # dropout p=0.0 -> identity

        out = lax.dot_general(attn.astype(cdt), v, dn_pv,
                              preferred_element_type=jnp.float32)               # (h,N,d) f32

        # --- reassociated output projection: sum_h out_h @ Wo_h  + bias ---
        yh = lax.dot_general(out.astype(wo.dtype), wo, dn_out,
                             preferred_element_type=jnp.float32)                # (h,N,Dq) f32
        y = jnp.sum(yh, axis=0) + bo                                            # (N,Dq) f32
        o_ref[b] = y.astype(o_ref.dtype)


# ------------------------------ module wrapper -------------------------------

def init_cross_attention_params(key, query_dim, heads, dim_head, dtype=jnp.float32):
    inner = heads * dim_head
    k1, k2, k3, k4 = jax.random.split(key, 4)
    # weights stored already transposed relative to torch nn.Linear: (in, out)
    return {
        "to_q_w": (jax.random.normal(k1, (query_dim, inner), dtype) * 0.05),
        "to_kv_w": (jax.random.normal(k2, (query_dim, 2 * inner), dtype) * 0.05),
        "to_out_w": (jax.random.normal(k3, (inner, query_dim), dtype) * 0.05),
        "to_out_b": (jax.random.normal(k4, (query_dim,), dtype) * 0.05),
    }


def cross_attention_forward(params, x, context, *, heads, dim_head,
                            batch_block=None, compute_dtype=None):
    """Single fused pallas_call.

    batch_block: rows of the batch handled per grid step.
        None (default) -> whole batch in one step (best on single-TC v5e/v6e).
        B // 2         -> grid=(2,) fat blocks, one per TensorCore on v7x.
    compute_dtype: optional dtype (e.g. jnp.bfloat16) for the MXU operands;
        accumulation and softmax stay f32, output keeps x.dtype.
    """
    B, N, Dq = x.shape
    _, M, _ = context.shape
    inner = heads * dim_head
    scale = float(dim_head) ** (-0.5)
    out_dtype = x.dtype

    if batch_block is None:
        batch_block = B                   # collapse the batch grid into one step
    assert B % batch_block == 0
    num_blocks = B // batch_block

    # --- wrapper-side weight prep (free relative to the kernel) ---
    wq = params["to_q_w"]                               # (Dq, inner)
    wkv = params["to_kv_w"]                             # (Dq, 2*inner)
    wk, wv = wkv[:, :inner], wkv[:, inner:]             # split kv HERE, not in-kernel
    wo = params["to_out_w"]                             # (inner, Dq)
    bo = params["to_out_b"].reshape(1, Dq).astype(jnp.float32)

    def head_major_in(w):                                # (Dq, h*d) -> (h, Dq, d)
        return w.reshape(Dq, heads, dim_head).transpose(1, 0, 2)

    wq3 = head_major_in(wq)
    wk3 = head_major_in(wk)
    wv3 = head_major_in(wv)
    wo3 = wo.reshape(heads, dim_head, Dq)                # (h, d, Dq)

    if compute_dtype is not None:
        x = x.astype(compute_dtype)
        context = context.astype(compute_dtype)
        wq3 = wq3.astype(compute_dtype)
        wk3 = wk3.astype(compute_dtype)
        wv3 = wv3.astype(compute_dtype)
        wo3 = wo3.astype(compute_dtype)

    kern = functools.partial(_fused_cross_attention_kernel, heads=heads, scale=scale)

    return pl.pallas_call(
        kern,
        out_shape=jax.ShapeDtypeStruct((B, N, Dq), out_dtype),
        grid=(num_blocks,),
        in_specs=[
            pl.BlockSpec((batch_block, N, Dq), lambda i: (i, 0, 0)),      # x
            pl.BlockSpec((batch_block, M, Dq), lambda i: (i, 0, 0)),      # context
            pl.BlockSpec((heads, Dq, dim_head), lambda i: (0, 0, 0)),     # Wq  (resident)
            pl.BlockSpec((heads, Dq, dim_head), lambda i: (0, 0, 0)),     # Wk  (resident)
            pl.BlockSpec((heads, Dq, dim_head), lambda i: (0, 0, 0)),     # Wv  (resident)
            pl.BlockSpec((heads, dim_head, Dq), lambda i: (0, 0, 0)),     # Wo  (resident)
            pl.BlockSpec((1, Dq), lambda i: (0, 0)),                      # bias (resident)
        ],
        out_specs=pl.BlockSpec((batch_block, N, Dq), lambda i: (i, 0, 0)),  # full Dq last dim
        compiler_params=pltpu.CompilerParams(
            dimension_semantics=("parallel",)),           # batch-block axis -> 2 TCs on v7x
    )(x, context, wq3, wk3, wv3, wo3, bo)


# ------------------------------ pure-JAX reference ---------------------------

def cross_attention_reference(params, x, context, *, heads, dim_head):
    B, N, Dq = x.shape
    _, M, _ = context.shape
    inner = heads * dim_head
    scale = float(dim_head) ** (-0.5)
    q = x @ params["to_q_w"]
    kv = context @ params["to_kv_w"]
    k, v = kv[..., :inner], kv[..., inner:]
    qh = q.reshape(B, N, heads, dim_head).transpose(0, 2, 1, 3)
    kh = k.reshape(B, M, heads, dim_head).transpose(0, 2, 1, 3)
    vh = v.reshape(B, M, heads, dim_head).transpose(0, 2, 1, 3)
    sim = jnp.einsum("bhnd,bhmd->bhnm", qh, kh) * scale
    attn = jax.nn.softmax(sim, axis=-1)
    oh = jnp.einsum("bhnm,bhmd->bhnd", attn, vh)
    out = oh.transpose(0, 2, 1, 3).reshape(B, N, inner)
    return out @ params["to_out_w"] + params["to_out_b"]


# ----------------------------------- main ------------------------------------

if __name__ == "__main__":
    # small shapes consistent with the module's forward
    B, N, M = 2, 8, 16            # batch, query seq, context seq
    query_dim = 32
    heads, dim_head = 4, 8        # inner_dim = 32

    key = jax.random.PRNGKey(0)
    kp, kx, kc = jax.random.split(key, 3)
    params = init_cross_attention_params(kp, query_dim, heads, dim_head)
    x = jax.random.normal(kx, (B, N, query_dim), jnp.float32)
    context = jax.random.normal(kc, (B, M, query_dim), jnp.float32)

    y = cross_attention_forward(params, x, context, heads=heads, dim_head=dim_head)
    y = jax.block_until_ready(y)

    y_ref = cross_attention_reference(params, x, context, heads=heads, dim_head=dim_head)
    # tolerance loosened slightly vs 1e-4 because softmax uses the EUP approx reciprocal
    np.testing.assert_allclose(np.asarray(y), np.asarray(y_ref), rtol=2e-3, atol=2e-3)

    print("KERNEL_OK")
</pallas_src>

<mosaic_0001>
module attributes {stable_mosaic.version = 11 : i64} {
  func.func @_fused_cross_attention_kernel(%arg0: i32, %arg1: memref<2x8x32xf32, #tpu.memory_space<vmem>>, %arg2: memref<2x16x32xf32, #tpu.memory_space<vmem>>, %arg3: memref<4x32x8xf32, #tpu.memory_space<vmem>>, %arg4: memref<4x32x8xf32, #tpu.memory_space<vmem>>, %arg5: memref<4x32x8xf32, #tpu.memory_space<vmem>>, %arg6: memref<4x8x32xf32, #tpu.memory_space<vmem>>, %arg7: memref<1x32xf32, #tpu.memory_space<vmem>>, %arg8: memref<2x8x32xf32, #tpu.memory_space<vmem>>) attributes {dimension_semantics = [#tpu.dimension_semantics<parallel>], iteration_bounds = array<i64: 1>, scalar_prefetch = 0 : i64, scratch_operands = 0 : i64, tpu.core_type = #tpu.core_type<tc>, window_params = [{transform_indices = @transform_0, window_bounds = array<i64: 2, 8, 32>}, {transform_indices = @transform_1, window_bounds = array<i64: 2, 16, 32>}, {pipeline_mode = #tpu.pipeline_mode<synchronous>, transform_indices = @transform_2, window_bounds = array<i64: 4, 32, 8>}, {pipeline_mode = #tpu.pipeline_mode<synchronous>, transform_indices = @transform_3, window_bounds = array<i64: 4, 32, 8>}, {pipeline_mode = #tpu.pipeline_mode<synchronous>, transform_indices = @transform_4, window_bounds = array<i64: 4, 32, 8>}, {pipeline_mode = #tpu.pipeline_mode<synchronous>, transform_indices = @transform_5, window_bounds = array<i64: 4, 8, 32>}, {pipeline_mode = #tpu.pipeline_mode<synchronous>, transform_indices = @transform_6, window_bounds = array<i64: 1, 32>}, {transform_indices = @transform_7, window_bounds = array<i64: 2, 8, 32>}]} {
    %c0 = arith.constant 0 : index
    %c0_0 = arith.constant 0 : index
    %c0_1 = arith.constant 0 : index
    %0 = vector.load %arg3[%c0, %c0_0, %c0_1] : memref<4x32x8xf32, #tpu.memory_space<vmem>>, vector<4x32x8xf32>
    %c0_2 = arith.constant 0 : index
    %c0_3 = arith.constant 0 : index
    %c0_4 = arith.constant 0 : index
    %1 = vector.load %arg4[%c0_2, %c0_3, %c0_4] : memref<4x32x8xf32, #tpu.memory_space<vmem>>, vector<4x32x8xf32>
    %c0_5 = arith.constant 0 : index
    %c0_6 = arith.constant 0 : index
    %c0_7 = arith.constant 0 : index
    %2 = vector.load %arg5[%c0_5, %c0_6, %c0_7] : memref<4x32x8xf32, #tpu.memory_space<vmem>>, vector<4x32x8xf32>
    %c0_8 = arith.constant 0 : index
    %c0_9 = arith.constant 0 : index
    %c0_10 = arith.constant 0 : index
    %3 = vector.load %arg6[%c0_8, %c0_9, %c0_10] : memref<4x8x32xf32, #tpu.memory_space<vmem>>, vector<4x8x32xf32>
    %c0_11 = arith.constant 0 : index
    %c0_12 = arith.constant 0 : index
    %4 = vector.load %arg7[%c0_11, %c0_12] : memref<1x32xf32, #tpu.memory_space<vmem>>, vector<1x32xf32>
    %c0_13 = arith.constant 0 : index
    %c0_14 = arith.constant 0 : index
    %c0_15 = arith.constant 0 : index
    %5 = vector.load %arg1[%c0_13, %c0_14, %c0_15] : memref<2x8x32xf32, #tpu.memory_space<vmem>>, vector<1x8x32xf32>
    %6 = vector.shape_cast %5 : vector<1x8x32xf32> to vector<8x32xf32>
    %7 = vector.shape_cast %6 : vector<8x32xf32> to vector<1x8x32xf32>
    %8 = vector.broadcast %7 : vector<1x8x32xf32> to vector<4x8x32xf32>
    %c0_16 = arith.constant 0 : index
    %c0_17 = arith.constant 0 : index
    %c0_18 = arith.constant 0 : index
    %9 = vector.load %arg2[%c0_16, %c0_17, %c0_18] : memref<2x16x32xf32, #tpu.memory_space<vmem>>, vector<1x16x32xf32>
    %10 = vector.shape_cast %9 : vector<1x16x32xf32> to vector<16x32xf32>
    %11 = vector.shape_cast %10 : vector<16x32xf32> to vector<1x16x32xf32>
    %12 = vector.broadcast %11 : vector<1x16x32xf32> to vector<4x16x32xf32>
    %cst = arith.constant dense<0.000000e+00> : vector<4x8x8xf32>
    %13 = tpu.matmul %8, %0, %cst {dimension_numbers = #tpu.dot_dimension_numbers<[2], [1], [1], [2], [0, 0, 0, 1, 1, 2], [0], [0]>} : vector<4x8x32xf32>, vector<4x32x8xf32>, vector<4x8x8xf32> -> vector<4x8x8xf32>
    %cst_19 = arith.constant dense<0.000000e+00> : vector<4x16x8xf32>
    %14 = tpu.matmul %12, %1, %cst_19 {dimension_numbers = #tpu.dot_dimension_numbers<[2], [1], [1], [2], [0, 0, 0, 1, 1, 2], [0], [0]>} : vector<4x16x32xf32>, vector<4x32x8xf32>, vector<4x16x8xf32> -> vector<4x16x8xf32>
    %cst_20 = arith.constant dense<0.000000e+00> : vector<4x16x8xf32>
    %15 = tpu.matmul %12, %2, %cst_20 {dimension_numbers = #tpu.dot_dimension_numbers<[2], [1], [1], [2], [0, 0, 0, 1, 1, 2], [0], [0]>} : vector<4x16x32xf32>, vector<4x32x8xf32>, vector<4x16x8xf32> -> vector<4x16x8xf32>
    %cst_21 = arith.constant 0.353553385 : f32
    %16 = vector.broadcast %cst_21 : f32 to vector<4x8x8xf32>
    %17 = arith.mulf %13, %16 : vector<4x8x8xf32>
    %cst_22 = arith.constant dense<0.000000e+00> : vector<4x8x16xf32>
    %18 = tpu.matmul %17, %14, %cst_22 {dimension_numbers = #tpu.dot_dimension_numbers<[2], [2], [1], [1], [0, 0, 0, 1, 1, 1], [0], [0]>} : vector<4x8x8xf32>, vector<4x16x8xf32>, vector<4x8x16xf32> -> vector<4x8x16xf32>
    %cst_23 = arith.constant dense<0xFF800000> : vector<4x8xf32>
    %19 = vector.multi_reduction <maximumf>, %18, %cst_23 [2] : vector<4x8x16xf32> to vector<4x8xf32>
    %20 = vector.shape_cast %19 : vector<4x8xf32> to vector<4x8x1xf32>
    %21 = vector.broadcast %20 : vector<4x8x1xf32> to vector<4x8x16xf32>
    %22 = arith.subf %18, %21 : vector<4x8x16xf32>
    %23 = math.exp %22 : vector<4x8x16xf32>
    %cst_24 = arith.constant dense<0.000000e+00> : vector<4x8xf32>
    %24 = vector.multi_reduction <add>, %23, %cst_24 [2] : vector<4x8x16xf32> to vector<4x8xf32>
    %25 = vector.shape_cast %24 : vector<4x8xf32> to vector<4x8x1xf32>
    %26 = tpu.reciprocal %25 {approx = true} : vector<4x8x1xf32> -> vector<4x8x1xf32>
    %27 = vector.broadcast %26 : vector<4x8x1xf32> to vector<4x8x16xf32>
    %28 = arith.mulf %23, %27 : vector<4x8x16xf32>
    %cst_25 = arith.constant dense<0.000000e+00> : vector<4x8x8xf32>
    %29 = tpu.matmul %28, %15, %cst_25 {dimension_numbers = #tpu.dot_dimension_numbers<[2], [1], [1], [2], [0, 0, 0, 1, 1, 2], [0], [0]>} : vector<4x8x16xf32>, vector<4x16x8xf32>, vector<4x8x8xf32> -> vector<4x8x8xf32>
    %cst_26 = arith.constant dense<0.000000e+00> : vector<4x8x32xf32>
    %30 = tpu.matmul %29, %3, %cst_26 {dimension_numbers = #tpu.dot_dimension_numbers<[2], [1], [1], [2], [0, 0, 0, 1, 1, 2], [0], [0]>} : vector<4x8x8xf32>, vector<4x8x32xf32>, vector<4x8x32xf32> -> vector<4x8x32xf32>
    %cst_27 = arith.constant dense<0.000000e+00> : vector<8x32xf32>
    %31 = vector.multi_reduction <add>, %30, %cst_27 [0] : vector<4x8x32xf32> to vector<8x32xf32>
    %32 = vector.broadcast %4 : vector<1x32xf32> to vector<8x32xf32>
    %33 = arith.addf %31, %32 : vector<8x32xf32>
    %c0_28 = arith.constant 0 : index
    %c0_29 = arith.constant 0 : index
    %c0_30 = arith.constant 0 : index
    %34 = vector.load %arg8[%c0_28, %c0_29, %c0_30] : memref<2x8x32xf32, #tpu.memory_space<vmem>>, vector<1x8x32xf32>
    %35 = vector.shape_cast %34 : vector<1x8x32xf32> to vector<8x32xf32>
    %36 = vector.shape_cast %33 : vector<8x32xf32> to vector<1x8x32xf32>
    tpu.vector_store %arg8[%c0_28, %c0_29, %c0_30], %36 {strides = array<i32>} : memref<2x8x32xf32, #tpu.memory_space<vmem>>, vector<1x8x32xf32>,
    %c1 = arith.constant 1 : index
    %c0_31 = arith.constant 0 : index
    %c0_32 = arith.constant 0 : index
    %37 = vector.load %arg1[%c1, %c0_31, %c0_32] : memref<2x8x32xf32, #tpu.memory_space<vmem>>, vector<1x8x32xf32>
    %38 = vector.shape_cast %37 : vector<1x8x32xf32> to vector<8x32xf32>
    %39 = vector.shape_cast %38 : vector<8x32xf32> to vector<1x8x32xf32>
    %40 = vector.broadcast %39 : vector<1x8x32xf32> to vector<4x8x32xf32>
    %c1_33 = arith.constant 1 : index
    %c0_34 = arith.constant 0 : index
    %c0_35 = arith.constant 0 : index
    %41 = vector.load %arg2[%c1_33, %c0_34, %c0_35] : memref<2x16x32xf32, #tpu.memory_space<vmem>>, vector<1x16x32xf32>
    %42 = vector.shape_cast %41 : vector<1x16x32xf32> to vector<16x32xf32>
    %43 = vector.shape_cast %42 : vector<16x32xf32> to vector<1x16x32xf32>
    %44 = vector.broadcast %43 : vector<1x16x32xf32> to vector<4x16x32xf32>
    %cst_36 = arith.constant dense<0.000000e+00> : vector<4x8x8xf32>
    %45 = tpu.matmul %40, %0, %cst_36 {dimension_numbers = #tpu.dot_dimension_numbers<[2], [1], [1], [2], [0, 0, 0, 1, 1, 2], [0], [0]>} : vector<4x8x32xf32>, vector<4x32x8xf32>, vector<4x8x8xf32> -> vector<4x8x8xf32>
    %cst_37 = arith.constant dense<0.000000e+00> : vector<4x16x8xf32>
    %46 = tpu.matmul %44, %1, %cst_37 {dimension_numbers = #tpu.dot_dimension_numbers<[2], [1], [1], [2], [0, 0, 0, 1, 1, 2], [0], [0]>} : vector<4x16x32xf32>, vector<4x32x8xf32>, vector<4x16x8xf32> -> vector<4x16x8xf32>
    %cst_38 = arith.constant dense<0.000000e+00> : vector<4x16x8xf32>
    %47 = tpu.matmul %44, %2, %cst_38 {dimension_numbers = #tpu.dot_dimension_numbers<[2], [1], [1], [2], [0, 0, 0, 1, 1, 2], [0], [0]>} : vector<4x16x32xf32>, vector<4x32x8xf32>, vector<4x16x8xf32> -> vector<4x16x8xf32>
    %cst_39 = arith.constant 0.353553385 : f32
    %48 = vector.broadcast %cst_39 : f32 to vector<4x8x8xf32>
    %49 = arith.mulf %45, %48 : vector<4x8x8xf32>
    %cst_40 = arith.constant dense<0.000000e+00> : vector<4x8x16xf32>
    %50 = tpu.matmul %49, %46, %cst_40 {dimension_numbers = #tpu.dot_dimension_numbers<[2], [2], [1], [1], [0, 0, 0, 1, 1, 1], [0], [0]>} : vector<4x8x8xf32>, vector<4x16x8xf32>, vector<4x8x16xf32> -> vector<4x8x16xf32>
    %cst_41 = arith.constant dense<0xFF800000> : vector<4x8xf32>
    %51 = vector.multi_reduction <maximumf>, %50, %cst_41 [2] : vector<4x8x16xf32> to vector<4x8xf32>
    %52 = vector.shape_cast %51 : vector<4x8xf32> to vector<4x8x1xf32>
    %53 = vector.broadcast %52 : vector<4x8x1xf32> to vector<4x8x16xf32>
    %54 = arith.subf %50, %53 : vector<4x8x16xf32>
    %55 = math.exp %54 : vector<4x8x16xf32>
    %cst_42 = arith.constant dense<0.000000e+00> : vector<4x8xf32>
    %56 = vector.multi_reduction <add>, %55, %cst_42 [2] : vector<4x8x16xf32> to vector<4x8xf32>
    %57 = vector.shape_cast %56 : vector<4x8xf32> to vector<4x8x1xf32>
    %58 = tpu.reciprocal %57 {approx = true} : vector<4x8x1xf32> -> vector<4x8x1xf32>
    %59 = vector.broadcast %58 : vector<4x8x1xf32> to vector<4x8x16xf32>
    %60 = arith.mulf %55, %59 : vector<4x8x16xf32>
    %cst_43 = arith.constant dense<0.000000e+00> : vector<4x8x8xf32>
    %61 = tpu.matmul %60, %47, %cst_43 {dimension_numbers = #tpu.dot_dimension_numbers<[2], [1], [1], [2], [0, 0, 0, 1, 1, 2], [0], [0]>} : vector<4x8x16xf32>, vector<4x16x8xf32>, vector<4x8x8xf32> -> vector<4x8x8xf32>
    %cst_44 = arith.constant dense<0.000000e+00> : vector<4x8x32xf32>
    %62 = tpu.matmul %61, %3, %cst_44 {dimension_numbers = #tpu.dot_dimension_numbers<[2], [1], [1], [2], [0, 0, 0, 1, 1, 2], [0], [0]>} : vector<4x8x8xf32>, vector<4x8x32xf32>, vector<4x8x32xf32> -> vector<4x8x32xf32>
    %cst_45 = arith.constant dense<0.000000e+00> : vector<8x32xf32>
    %63 = vector.multi_reduction <add>, %62, %cst_45 [0] : vector<4x8x32xf32> to vector<8x32xf32>
    %64 = vector.broadcast %4 : vector<1x32xf32> to vector<8x32xf32>
    %65 = arith.addf %63, %64 : vector<8x32xf32>
    %c1_46 = arith.constant 1 : index
    %c0_47 = arith.constant 0 : index
    %c0_48 = arith.constant 0 : index
    %66 = vector.load %arg8[%c1_46, %c0_47, %c0_48] : memref<2x8x32xf32, #tpu.memory_space<vmem>>, vector<1x8x32xf32>
    %67 = vector.shape_cast %66 : vector<1x8x32xf32> to vector<8x32xf32>
    %68 = vector.shape_cast %65 : vector<8x32xf32> to vector<1x8x32xf32>
    tpu.vector_store %arg8[%c1_46, %c0_47, %c0_48], %68 {strides = array<i32>} : memref<2x8x32xf32, #tpu.memory_space<vmem>>, vector<1x8x32xf32>,
    return
  }
  func.func @transform_0(%arg0: i32) -> (i32, i32, i32) {
    %c0_i32 = arith.constant 0 : i32
    %c0_i32_0 = arith.constant 0 : i32
    %c0_i32_1 = arith.constant 0 : i32
    return %arg0, %c0_i32, %c0_i32_0 : i32, i32, i32
  }
  func.func @transform_1(%arg0: i32) -> (i32, i32, i32) {
    %c0_i32 = arith.constant 0 : i32
    %c0_i32_0 = arith.constant 0 : i32
    %c0_i32_1 = arith.constant 0 : i32
    return %arg0, %c0_i32, %c0_i32_0 : i32, i32, i32
  }
  func.func @transform_2(%arg0: i32) -> (i32, i32, i32) {
    %c0_i32 = arith.constant 0 : i32
    %c0_i32_0 = arith.constant 0 : i32
    %c0_i32_1 = arith.constant 0 : i32
    %c0_i32_2 = arith.constant 0 : i32
    return %c0_i32, %c0_i32_0, %c0_i32_1 : i32, i32, i32
  }
  func.func @transform_3(%arg0: i32) -> (i32, i32, i32) {
    %c0_i32 = arith.constant 0 : i32
    %c0_i32_0 = arith.constant 0 : i32
    %c0_i32_1 = arith.constant 0 : i32
    %c0_i32_2 = arith.constant 0 : i32
    return %c0_i32, %c0_i32_0, %c0_i32_1 : i32, i32, i32
  }
  func.func @transform_4(%arg0: i32) -> (i32, i32, i32) {
    %c0_i32 = arith.constant 0 : i32
    %c0_i32_0 = arith.constant 0 : i32
    %c0_i32_1 = arith.constant 0 : i32
    %c0_i32_2 = arith.constant 0 : i32
    return %c0_i32, %c0_i32_0, %c0_i32_1 : i32, i32, i32
  }
  func.func @transform_5(%arg0: i32) -> (i32, i32, i32) {
    %c0_i32 = arith.constant 0 : i32
    %c0_i32_0 = arith.constant 0 : i32
    %c0_i32_1 = arith.constant 0 : i32
    %c0_i32_2 = arith.constant 0 : i32
    return %c0_i32, %c0_i32_0, %c0_i32_1 : i32, i32, i32
  }
  func.func @transform_6(%arg0: i32) -> (i32, i32) {
    %c0_i32 = arith.constant 0 : i32
    %c0_i32_0 = arith.constant 0 : i32
    %c0_i32_1 = arith.constant 0 : i32
    return %c0_i32, %c0_i32_0 : i32, i32
  }
  func.func @transform_7(%arg0: i32) -> (i32, i32, i32) {
    %c0_i32 = arith.constant 0 : i32
    %c0_i32_0 = arith.constant 0 : i32
    %c0_i32_1 = arith.constant 0 : i32
    return %arg0, %c0_i32, %c0_i32_0 : i32, i32, i32
  }
}

</mosaic_0001>

<bundles_post_ra>
// kernel: tpu_custom_call.1
= control target key start
LH: loop header
LB: loop body
LE: loop exit
PB: predicated region body
PF: predicated region fallthrough
CT: control target
= control target key end

     0   :  { %v5368_v2 = vmov 0.0   ;;  %vm83_vm0 = vcmask 261120   ;;  %vm4566_vm1 = vmmov 0   ;;  %s5360_s0 = inlined_call_operand.vmem [shape: f32[2,8,32], index: 0, kind: input, shape index: {}]   ;;  %s5361_s1 = inlined_call_operand.vmem [shape: f32[2,16,32], index: 1, kind: input, shape index: {}]   ;;  %s5362_s2 = inlined_call_operand.vmem [shape: f32[4,32,8], index: 2, kind: input, shape index: {}]   ;;  %s5363_s3 = inlined_call_operand.vmem [shape: f32[4,32,8], index: 3, kind: input, shape index: {}]   ;;  %s5364_s4 = inlined_call_operand.vmem [shape: f32[4,32,8], index: 4, kind: input, shape index: {}]   ;;  %s5365_s5 = inlined_call_operand.vmem [shape: f32[4,8,32], index: 5, kind: input, shape index: {}]   ;;  %s5366_s6 = inlined_call_operand.vmem [shape: f32[1,32], index: 6, kind: input, shape index: {}]   ;;  %s5367_s7 = inlined_call_operand.hbm [shape: f32[2,8,32], index: 7, kind: output, shape index: {}]  }
   0x1   :  { %v4613_v0 = vld [vmem:[%s5362_s2 + $0x18] sm:$0xff]  ;;  %4090 = vmatprep.subr.mxu0 %v5368_v2  ;;  %4101 = vmatprep.subr.mxu1 %v5368_v2  ;;  %v4625_v3 = vld [vmem:[%s5362_s2 + $0x10] sm:$0xff]  ;;  %v4639_v5 = vld [vmem:[%s5362_s2 + $0x8] sm:$0xff] }
   0x2   :  { %v4618_v1 = vld [vmem:[%s5362_s2 + $0x38] sm:$0xff]  ;;  %v4630_v4 = vld [vmem:[%s5362_s2 + $0x30] sm:$0xff]  ;;  %4091 = vmatpush3.msra.mxu0 %v4613_v0  ;;  %v4644_v6 = vld [vmem:[%s5362_s2 + $0x28] sm:$0xff]  ;;  %4098 = vmatprep.mubr.msk.f32.mxu0 %vm4566_vm1, %v5368_v2 }
   0x3   :  { %4102 = vmatpush3.msra.mxu1 %v4618_v1  ;;  %4092 = vmatprep.subr.mxu0 %v5368_v2  ;;  %v4653_v7 = vld [vmem:[%s5362_s2] sm:$0xff]  ;;  %v4675_v10 = vld [vmem:[%s5362_s2 + $0x58] sm:$0xff]  ;;  %v4690_v12 = vld [vmem:[%s5362_s2 + $0x50] sm:$0xff] }
   0x4   :  { %4103 = vmatprep.subr.mxu1 %v5368_v2  ;;  %4093 = vmatpush3.msra.mxu0 %v4625_v3  ;;  %v4660_v8 = vld [vmem:[%s5362_s2 + $0x20] sm:$0xff]  ;;  %v4680_v11 = vld [vmem:[%s5362_s2 + $0x78] sm:$0xff]  ;;  %v4695_v13 = vld [vmem:[%s5362_s2 + $0x70] sm:$0xff] }
   0x5   :  { %4104 = vmatpush3.msra.mxu1 %v4630_v4  ;;  %4094 = vmatprep.subr.mxu0 %v5368_v2  ;;  %v80_v9 = vld [vmem:[%s5360_s0] sm:$0xff] }
   0x6   :  { %4105 = vmatprep.subr.mxu1 %v5368_v2  ;;  %4095 = vmatpush3.msra.mxu0 %v4639_v5 }
   0x7   :  { %4106 = vmatpush3.msra.mxu1 %v4644_v6  ;;  %4096 = vmatprep.subr.mxu0 %v5368_v2 }
   0x8   :  { %4107 = vmatprep.subr.mxu1 %v5368_v2  ;;  %4097 = vmatpush3.msra.mxu0 %v4653_v7 }
   0x9   :  { %4108 = vmatpush3.msra.mxu1 %v4660_v8  ;;  %4099 = vmatmul.mubr.msk.f32.vlgmr.msra.gmra.mxu0 %vm83_vm0, %v80_v9 }
   0xa   :  { %4109 = vmatprep.mubr.msk.f32.mxu1 %vm4566_vm1, %v5368_v2  ;;  %4112 = vmatprep.subr.mxu0 %v5368_v2 }
   0xb   :  { %4123 = vmatprep.subr.mxu1 %v5368_v2  ;;  %4110 = vmatmul.mubr.msk.f32.vlgmr.msra.gmra.mxu1 %vm83_vm0, %v80_v9 }
   0xc   :  { %4113 = vmatpush3.msra.mxu0 %v4675_v10  ;;  %4124 = vmatpush3.msra.mxu1 %v4680_v11 }
   0xd   :  { %12 = vsyncpa [#allocation3], 0  ;;  %4114 = vmatprep.subr.mxu0 %v5368_v2  ;;  %4125 = vmatprep.subr.mxu1 %v5368_v2  ;;  %v4704_v14 = vld [vmem:[%s5362_s2 + $0x48] sm:$0xff]  ;;  %v4718_v16 = vld [vmem:[%s5362_s2 + $0x40] sm:$0xff]  ;;  %vm977_vm2 = vcmask 64512   ;;  %vm1294_vm3 = vcmask 130048  }
   0xe   :  { %v4709_v15 = vld [vmem:[%s5362_s2 + $0x68] sm:$0xff]  ;;  %4115 = vmatpush3.msra.mxu0 %v4690_v12  ;;  %4126 = vmatpush3.msra.mxu1 %v4695_v13  ;;  %v4725_v17 = vld [vmem:[%s5362_s2 + $0x60] sm:$0xff]  ;;  %v4732_v18 = vld [vmem:[%s5363_s3 + $0x18] sm:$0xff] }
   0xf   :  { %4116 = vmatprep.subr.mxu0 %v5368_v2  ;;  %4127 = vmatprep.subr.mxu1 %v5368_v2  ;;  %v4740_v19 = vld [vmem:[%s5363_s3 + $0x38] sm:$0xff]  ;;  %v4750_v20 = vld [vmem:[%s5363_s3 + $0x10] sm:$0xff]  ;;  %v4764_v22 = vld [vmem:[%s5363_s3 + $0x8] sm:$0xff] }
  0x10   :  { %4117 = vmatpush3.msra.mxu0 %v4704_v14  ;;  %4128 = vmatpush3.msra.mxu1 %v4709_v15  ;;  %v4755_v21 = vld [vmem:[%s5363_s3 + $0x30] sm:$0xff]  ;;  %v4769_v23 = vld [vmem:[%s5363_s3 + $0x28] sm:$0xff]  ;;  %v4778_v24 = vld [vmem:[%s5363_s3] sm:$0xff] }
  0x11   :  { %4118 = vmatprep.subr.mxu0 %v5368_v2  ;;  %4129 = vmatprep.subr.mxu1 %v5368_v2  ;;  %v4783_v25 = vld [vmem:[%s5363_s3 + $0x20] sm:$0xff]  ;;  %v4799_v27 = vld [vmem:[%s5361_s1 + $0x8] sm:$0xff]  ;;  %v4807_v28 = vld [vmem:[%s5363_s3 + $0x58] sm:$0xff] }
  0x12   :  { %4119 = vmatpush3.msra.mxu0 %v4718_v16  ;;  %4120 = vmatprep.mubr.msk.f32.mxu0 %vm4566_vm1, %v5368_v2  ;;  %v4790_v26 = vld [vmem:[%s5361_s1] sm:$0xff]  ;;  %v4812_v29 = vld [vmem:[%s5363_s3 + $0x78] sm:$0xff]  ;;  %v4824_v30 = vld [vmem:[%s5363_s3 + $0x50] sm:$0xff] }
  0x13   :  { %4130 = vmatpush3.msra.mxu1 %v4725_v17  ;;  %4121 = vmatmul.mubr.msk.f32.vlgmr.msra.gmra.mxu0 %vm83_vm0, %v80_v9  ;;  %v4829_v31 = vld [vmem:[%s5363_s3 + $0x70] sm:$0xff]  ;;  %v4838_v32 = vld [vmem:[%s5363_s3 + $0x48] sm:$0xff]  ;;  %v4852_v34 = vld [vmem:[%s5363_s3 + $0x40] sm:$0xff] }
  0x14   :  { %4131 = vmatprep.mubr.msk.f32.mxu1 %vm4566_vm1, %v5368_v2  ;;  %4134 = vmatprep.subr.mxu0 %v4732_v18  ;;  %v4843_v33 = vld [vmem:[%s5363_s3 + $0x68] sm:$0xff]  ;;  %v4857_v35 = vld [vmem:[%s5363_s3 + $0x60] sm:$0xff]  ;;  %v4871_v36 = vld [vmem:[%s5364_s4 + $0x18] sm:$0xff] }
  0x15   :  { %4145 = vmatprep.subr.mxu1 %v4740_v19  ;;  %4132 = vmatmul.mubr.msk.f32.vlgmr.msra.gmra.mxu1 %vm83_vm0, %v80_v9  ;;  %v4889_v37 = vld [vmem:[%s5364_s4 + $0x38] sm:$0xff]  ;;  %v4894_v38 = vld [vmem:[%s5364_s4 + $0x10] sm:$0xff]  ;;  %v4908_v40 = vld [vmem:[%s5364_s4 + $0x8] sm:$0xff] }
  0x16   :  { %4135 = vmatpush3.msra.mxu0 %v4732_v18  ;;  %4146 = vmatpush3.msra.mxu1 %v4740_v19  ;;  %v4901_v39 = vld [vmem:[%s5364_s4 + $0x30] sm:$0xff]  ;;  %v4913_v41 = vld [vmem:[%s5364_s4 + $0x28] sm:$0xff]  ;;  %v4920_v42 = vld [vmem:[%s5364_s4] sm:$0xff] }
  0x17   :  { %4136 = vmatprep.subr.mxu0 %v4750_v20  ;;  %4147 = vmatprep.subr.mxu1 %v4755_v21  ;;  %v4927_v43 = vld [vmem:[%s5364_s4 + $0x20] sm:$0xff]  ;;  %v4934_v44 = vld [vmem:[%s5364_s4 + $0x58] sm:$0xff]  ;;  %v4954_v46 = vld [vmem:[%s5364_s4 + $0x50] sm:$0xff] }
  0x18   :  { %4137 = vmatpush3.msra.mxu0 %v4750_v20  ;;  %4148 = vmatpush3.msra.mxu1 %v4755_v21  ;;  %v4949_v45 = vld [vmem:[%s5364_s4 + $0x78] sm:$0xff]  ;;  %5385 = vst [vmem:[#allocation6_spill] sm:$0xff] %v4954_v46  ;;  %v4965_v47 = vld [vmem:[%s5364_s4 + $0x70] sm:$0xff]  ;;  %v4972_v48 = vld [vmem:[%s5364_s4 + $0x48] sm:$0xff] }
  0x19   :  { %4138 = vmatprep.subr.mxu0 %v4764_v22  ;;  %4149 = vmatprep.subr.mxu1 %v4769_v23  ;;  %5384 = vst [vmem:[#allocation5_spill] sm:$0xff] %v4949_v45  ;;  %5386 = vst [vmem:[#allocation7_spill] sm:$0xff] %v4965_v47  ;;  %v4977_v49 = vld [vmem:[%s5364_s4 + $0x68] sm:$0xff]  ;;  %v4984_v50 = vld [vmem:[%s5364_s4 + $0x40] sm:$0xff] }
  0x1a   :  { %4139 = vmatpush3.msra.mxu0 %v4764_v22  ;;  %4150 = vmatpush3.msra.mxu1 %v4769_v23  ;;  %5387 = vst [vmem:[#allocation8_spill] sm:$0xff] %v4972_v48  ;;  %5388 = vst [vmem:[#allocation9_spill] sm:$0xff] %v4977_v49  ;;  %v4991_v51 = vld [vmem:[%s5364_s4 + $0x60] sm:$0xff] }
  0x1b   :  { %4140 = vmatprep.subr.mxu0 %v4778_v24  ;;  %4151 = vmatprep.subr.mxu1 %v4783_v25  ;;  %5389 = vst [vmem:[#allocation10_spill] sm:$0xff] %v4984_v50  ;;  %5390 = vst [vmem:[#allocation11_spill] sm:$0xff] %v4991_v51 }
  0x1c   :  { %4141 = vmatpush3.msra.mxu0 %v4778_v24  ;;  %4142 = vmatprep.mubr.msk.f32.mxu0 %vm83_vm0, %v4790_v26 }
  0x1d   :  { %4152 = vmatpush3.msra.mxu1 %v4783_v25  ;;  %4153 = vmatprep.mubr.msk.f32.mxu1 %vm83_vm0, %v4790_v26 }
  0x1e   :  { %4143 = vmatmul.mubr.msk.f32.vlgmr.msra.gmra.mxu0 %vm83_vm0, %v4799_v27  ;;  %4154 = vmatmul.mubr.msk.f32.vlgmr.msra.gmra.mxu1 %vm83_vm0, %v4799_v27 }
  0x1f   :  { %4156 = vmatprep.subr.mxu0 %v4807_v28  ;;  %4167 = vmatprep.subr.mxu1 %v4812_v29 }
  0x20   :  { %4157 = vmatpush3.msra.mxu0 %v4807_v28  ;;  %4168 = vmatpush3.msra.mxu1 %v4812_v29 }
  0x21   :  { %4158 = vmatprep.subr.mxu0 %v4824_v30  ;;  %4169 = vmatprep.subr.mxu1 %v4829_v31 }
  0x22   :  { %4159 = vmatpush3.msra.mxu0 %v4824_v30  ;;  %4170 = vmatpush3.msra.mxu1 %v4829_v31 }
  0x23   :  { %4160 = vmatprep.subr.mxu0 %v4838_v32  ;;  %4171 = vmatprep.subr.mxu1 %v4843_v33 }
  0x24   :  { %4161 = vmatpush3.msra.mxu0 %v4838_v32  ;;  %4172 = vmatpush3.msra.mxu1 %v4843_v33 }
  0x25   :  { %4162 = vmatprep.subr.mxu0 %v4852_v34  ;;  %4173 = vmatprep.subr.mxu1 %v4857_v35 }
  0x26   :  { %4163 = vmatpush3.msra.mxu0 %v4852_v34  ;;  %4164 = vmatprep.mubr.msk.f32.mxu0 %vm83_vm0, %v4790_v26 }
  0x27   :  { %4174 = vmatpush3.msra.mxu1 %v4857_v35  ;;  %4175 = vmatprep.mubr.msk.f32.mxu1 %vm83_vm0, %v4790_v26 }
  0x28   :  { %4165 = vmatmul.mubr.msk.f32.vlgmr.msra.gmra.mxu0 %vm83_vm0, %v4799_v27  ;;  %4176 = vmatmul.mubr.msk.f32.vlgmr.msra.gmra.mxu1 %vm83_vm0, %v4799_v27 }
  0x29   :  { %4178 = vmatprep.subr.mxu0 %v4871_v36  ;;  %4186 = vmatprep.mubr.msk.f32.mxu0 %vm83_vm0, %v4790_v26 }
  0x2a   :  { %4179 = vmatpush3.msra.mxu0 %v4871_v36  ;;  %4197 = vmatprep.mubr.msk.f32.mxu1 %vm83_vm0, %v4790_v26 }
  0x2b   :  { %4189 = vmatprep.subr.mxu1 %v4889_v37  ;;  %4180 = vmatprep.subr.mxu0 %v4894_v38 }
  0x2c   :  { %4190 = vmatpush3.msra.mxu1 %v4889_v37  ;;  %4181 = vmatpush3.msra.mxu0 %v4894_v38 }
  0x2d   :  { %4191 = vmatprep.subr.mxu1 %v4901_v39  ;;  %4182 = vmatprep.subr.mxu0 %v4908_v40 }
  0x2e   :  { %4192 = vmatpush3.msra.mxu1 %v4901_v39  ;;  %4183 = vmatpush3.msra.mxu0 %v4908_v40 }
  0x2f   :  { %4193 = vmatprep.subr.mxu1 %v4913_v41  ;;  %4184 = vmatprep.subr.mxu0 %v4920_v42 }
  0x30   :  { %4194 = vmatpush3.msra.mxu1 %v4913_v41  ;;  %4185 = vmatpush3.msra.mxu0 %v4920_v42 }
  0x31   :  { %4195 = vmatprep.subr.mxu1 %v4927_v43  ;;  %4187 = vmatmul.mubr.msk.f32.vlgmr.msra.gmra.mxu0 %vm83_vm0, %v4799_v27 }
  0x32   :  { %4196 = vmatpush3.msra.mxu1 %v4927_v43  ;;  %4200 = vmatprep.subr.mxu0 %v4934_v44 }
  0x33   :  { %4201 = vmatpush3.msra.mxu0 %v4934_v44  ;;  %4198 = vmatmul.mubr.msk.f32.vlgmr.msra.gmra.mxu1 %vm83_vm0, %v4799_v27 }
  0x34   :  { %4208 = vmatprep.mubr.msk.f32.mxu0 %vm83_vm0, %v4790_v26  ;;  %4219 = vmatprep.mubr.msk.f32.mxu1 %vm83_vm0, %v4790_v26 }
  0x35   :  { %4211 = vmatprep.subr.mxu1 %v4949_v45  ;;  %4202 = vmatprep.subr.mxu0 %v4954_v46 }
  0x36   :  { %4212 = vmatpush3.msra.mxu1 %v4949_v45  ;;  %4203 = vmatpush3.msra.mxu0 %v4954_v46 }
  0x37   :  { %4213 = vmatprep.subr.mxu1 %v4965_v47  ;;  %4204 = vmatprep.subr.mxu0 %v4972_v48 }
  0x38   :  { %4214 = vmatpush3.msra.mxu1 %v4965_v47  ;;  %4205 = vmatpush3.msra.mxu0 %v4972_v48 }
  0x39   :  { %4215 = vmatprep.subr.mxu1 %v4977_v49  ;;  %4206 = vmatprep.subr.mxu0 %v4984_v50 }
  0x3a   :  { %4216 = vmatpush3.msra.mxu1 %v4977_v49  ;;  %4207 = vmatpush3.msra.mxu0 %v4984_v50 }
  0x3b   :  { %4217 = vmatprep.subr.mxu1 %v4991_v51  ;;  %4209 = vmatmul.mubr.msk.f32.vlgmr.msra.gmra.mxu0 %vm83_vm0, %v4799_v27 }
  0x3c   :  { %4218 = vmatpush3.msra.mxu1 %v4991_v51  ;;  %4222 = vmatprep.subr.mxu0 %v5368_v2 }
  0x3d   :  { %4229 = vmatprep.subr.mxu1 %v5368_v2  ;;  %4220 = vmatmul.mubr.msk.f32.vlgmr.msra.gmra.mxu1 %vm83_vm0, %v4799_v27 }
  0x3e   :  { %4226 = vmatprep.mubr.msk.f32.mxu0 %vm4566_vm1, %v5368_v2  ;;  %4233 = vmatprep.mubr.msk.f32.mxu1 %vm4566_vm1, %v5368_v2 }
  0xc9   :  { %v153_v52 = vpop.f32.mrf.mxu0 }
  0xca   :  { %v973_v9 = vmul.f32 0.35355338, %v153_v52 }
  0xcb   :  { %v4100_v53 = vpop.f32.mrf.mxu0  ;;  %v223_v54 = vpop.f32.mrf.mxu1 }
  0xcc   :  { %v974_v26 = vmul.f32 0.35355338, %v223_v54 }
  0xcd   :  { %v4111_v55 = vpop.f32.mrf.mxu1 }
  0xd3   :  { %v293_v56 = vpop.f32.mrf.mxu0 }
  0xd4   :  { %v975_v55 = vmul.f32 0.35355338, %v293_v56 }
  0xd5   :  { %v4122_v57 = vpop.f32.mrf.mxu0  ;;  %v363_v58 = vpop.f32.mrf.mxu1 }
  0xd6   :  { %v976_v57 = vmul.f32 0.35355338, %v363_v58 }
  0xd7   :  { %v4133_v59 = vpop.f32.mrf.mxu1 }
  0xde   :  { %v4144_v60 = vpop.f32.mrf.mxu0  ;;  %v4155_v61 = vpop.f32.mrf.mxu1 }
  0xdf   :  { %4223 = vmatpush3.xpose.msk.msra.mxu0 %vm977_vm2, %v4144_v60  ;;  %4230 = vmatpush3.xpose.msk.msra.mxu1 %vm977_vm2, %v4155_v61 }
  0xe0   :  { %v514_v62 = vpop.f32.mrf.mxu1  ;;  %4224 = vmatprep.subr.mxu0 %v5368_v2  ;;  %4231 = vmatprep.subr.mxu1 %v5368_v2  ;;  %v439_v63 = vpop.f32.mrf.mxu0 }
  0xe3   :  { %4225 = vmatpush3.xpose.msk.msra.mxu0 %vm977_vm2, %v439_v63  ;;  %4232 = vmatpush3.xpose.msk.msra.mxu1 %vm977_vm2, %v514_v62 }
  0xe4   :  { %4236 = vmatprep.subr.mxu0 %v5368_v2  ;;  %4243 = vmatprep.subr.mxu1 %v5368_v2 }
  0xe6   :  { %4227 = vmatmul.mubr.msk.f32.vlgmr.msra.gmra.mxu0 %vm977_vm2, %v973_v9  ;;  %4234 = vmatmul.mubr.msk.f32.vlgmr.msra.gmra.mxu1 %vm977_vm2, %v974_v26 }
  0xe7   :  { %4240 = vmatprep.mubr.msk.f32.mxu0 %vm4566_vm1, %v5368_v2  ;;  %4247 = vmatprep.mubr.msk.f32.mxu1 %vm4566_vm1, %v5368_v2 }
  0xe8   :  { %v4166_v27 = vpop.f32.mrf.mxu0  ;;  %v4177_v53 = vpop.f32.mrf.mxu1 }
  0xe9   :  { %4237 = vmatpush3.xpose.msk.msra.mxu0 %vm977_vm2, %v4166_v27  ;;  %4244 = vmatpush3.xpose.msk.msra.mxu1 %vm977_vm2, %v4177_v53 }
  0xea   :  { %v664_v52 = vpop.f32.mrf.mxu1  ;;  %4238 = vmatprep.subr.mxu0 %v5368_v2  ;;  %4245 = vmatprep.subr.mxu1 %v5368_v2  ;;  %v589_v54 = vpop.f32.mrf.mxu0 }
  0xed   :  { %4239 = vmatpush3.xpose.msk.msra.mxu0 %vm977_vm2, %v589_v54  ;;  %4246 = vmatpush3.xpose.msk.msra.mxu1 %vm977_vm2, %v664_v52 }
  0xee   :  { %4250 = vmatprep.subr.mxu0 %v5368_v2  ;;  %4257 = vmatprep.subr.mxu1 %v5368_v2 }
  0xf0   :  { %4241 = vmatmul.mubr.msk.f32.vlgmr.msra.gmra.mxu0 %vm977_vm2, %v975_v55  ;;  %4248 = vmatmul.mubr.msk.f32.vlgmr.msra.gmra.mxu1 %vm977_vm2, %v976_v57 }
  0xf1   :  { %4254 = vmatprep.mubr.msk.f32.mxu0 %vm4566_vm1, %v5368_v2  ;;  %4261 = vmatprep.mubr.msk.f32.mxu1 %vm4566_vm1, %v5368_v2  ;;  %v4188_v59 = vpop.f32.mrf.mxu0 }
  0xf2   :  { %4251 = vmatpush3.msra.mxu0 %v4188_v59 }
  0xf3   :  { %v739_v60 = vpop.f32.mrf.mxu0  ;;  %4252 = vmatprep.subr.mxu0 %v5368_v2  ;;  %v4199_v56 = vpop.f32.mrf.mxu1 }
  0xf4   :  { %4253 = vmatpush3.msra.mxu0 %v739_v60  ;;  %4258 = vmatpush3.msra.mxu1 %v4199_v56 }
  0xf5   :  { %v814_v58 = vpop.f32.mrf.mxu1  ;;  %4259 = vmatprep.subr.mxu1 %v5368_v2  ;;  %4264 = vmatprep.subr.mxu0 %v5368_v2 }
  0xf6   :  { %4260 = vmatpush3.msra.mxu1 %v814_v58 }
  0xf7   :  { %4271 = vmatprep.subr.mxu1 %v5368_v2 }
  0xfb   :  { %v4210_v62 = vpop.f32.mrf.mxu0 }
  0xfd   :  { %v5041_v61 = vpop.f32.mrf.mxu1  ;;  %v889_v9 = vpop.f32.mrf.mxu0 }
  0xff   :  { %v5043_v63 = vpop.f32.mrf.mxu1 }
 0x1a6   :  { %v1053_v26 = vpop.f32.mrf.mxu0  ;;  %v1132_v27 = vpop.f32.mrf.mxu1 }
 0x1a7   :  { %v1295_v53 = vsel %vm1294_vm3, %v1053_v26, -inf  ;;  %v1298_v55 = vsel %vm1294_vm3, %v1132_v27, -inf }
 0x1a8   :  { %v4235_v52 = vpop.f32.mrf.mxu1  ;;  %1296 = vmax.xlane.f32.xlu0 %v1295_v53  ;;  %v4228_v54 = vpop.f32.mrf.mxu0 }
 0x1ac   :  { %1299 = vmax.xlane.f32.xlu0 %v1298_v55 }
 0x1b0   :  { %v1211_v57 = vpop.f32.mrf.mxu0  ;;  %v1290_v59 = vpop.f32.mrf.mxu1 }
 0x1b1   :  { %v1301_v60 = vsel %vm1294_vm3, %v1211_v57, -inf  ;;  %v1304_v2 = vsel %vm1294_vm3, %v1290_v59, -inf }
 0x1b2   :  { %v4249_v56 = vpop.f32.mrf.mxu1  ;;  %1302 = vmax.xlane.f32.xlu1 %v1301_v60  ;;  %v4242_v58 = vpop.f32.mrf.mxu0 }
 0x1b6   :  { %1305 = vmax.xlane.f32.xlu1 %v1304_v2 }
 0x231   :  { %v1297_v51 = vpop.xlane.xlu0 %1296 }
 0x232   :  { %v1307_v49 = vsub.f32 %v1053_v26, %v1297_v51 }
 0x234   :  { %v1311_v50 = vmul.f32 1.442695, %v1307_v49 }
 0x235   :  { %v1300_v47 = vpop.xlane.xlu0 %1299 }
 0x236   :  { %4511 = vpow2.f32 %v1311_v50  ;;  %v1308_v53 = vsub.f32 %v1132_v27, %v1300_v47 }
 0x238   :  { %v1313_v52 = vmul.f32 1.442695, %v1308_v53 }
 0x23a   :  { %4513 = vpow2.f32 %v1313_v52  ;;  %v5391_v52 = vmov 0.0  }
 0x23b   :  { %v1303_v54 = vpop.xlane.xlu1 %1302 }
 0x23c   :  { %v1309_v55 = vsub.f32 %v1211_v57, %v1303_v54 }
 0x23e   :  { %v1315_v48 = vmul.f32 1.442695, %v1309_v55 }
 0x23f   :  { %v1306_v45 = vpop.xlane.xlu1 %1305 }
 0x240   :  { %4515 = vpow2.f32 %v1315_v48  ;;  %v1310_v46 = vsub.f32 %v1290_v59, %v1306_v45 }
 0x242   :  { %v1317_v56 = vmul.f32 1.442695, %v1310_v46 }
 0x243   :  { %v4512_v60 = vpop.eup %4511 }
 0x244   :  { %4517 = vpow2.f32 %v1317_v56  ;;  %v1319_v58 = vsel %vm1294_vm3, %v4512_v60, 0.0 }
 0x245   :  { %1320 = vadd.xlane.f32.xlu0 %v1319_v58 }
 0x247   :  { %v4514_v2 = vpop.eup %4513 }
 0x248   :  { %v1322_v49 = vsel %vm1294_vm3, %v4514_v2, 0.0 }
 0x249   :  { %1323 = vadd.xlane.f32.xlu1 %v1322_v49  ;;  %v5098_v49 = vld [vmem:[%s5365_s5 + $0x18] sm:$0xff] }
 0x24d   :  { %v4516_v50 = vpop.eup %4515 }
 0x24e   :  { %v1325_v47 = vsel %vm1294_vm3, %v4516_v50, 0.0 }
 0x24f   :  { %1326 = vadd.xlane.f32.xlu0 %v1325_v47 }
 0x251   :  { %v4518_v51 = vpop.eup %4517 }
 0x252   :  { %v1328_v26 = vsel %vm1294_vm3, %v4518_v51, 0.0 }
 0x253   :  { %1329 = vadd.xlane.f32.xlu1 %v1328_v26 }
 0x2ce   :  { %v1321_v48 = vpop.xlane.xlu0 %1320 }
 0x2cf   :  { %4519 = vrcp.f32 %v1321_v48 }
 0x2d2   :  { %v1324_v45 = vpop.xlane.xlu1 %1323 }
 0x2d3   :  { %4521 = vrcp.f32 %v1324_v45 }
 0x2d8   :  { %v1327_v46 = vpop.xlane.xlu0 %1326 }
 0x2d9   :  { %4523 = vrcp.f32 %v1327_v46 }
 0x2dc   :  { %v4520_v27 = vpop.eup %4519  ;;  %v1330_v57 = vpop.xlane.xlu1 %1329 }
 0x2dd   :  { %4525 = vrcp.f32 %v1330_v57  ;;  %v1335_v59 = vmul.f32 %v4520_v27, %v4512_v60  ;;  %v5088_v60 = vld [vmem:[%s5365_s5 + $0x10] sm:$0xff] }
 0x2df   :  { %4255 = vmatmul.mubr.msk.f32.vlgmr.msra.gmra.mxu0 %vm1294_vm3, %v1335_v59 }
 0x2e0   :  { %v4522_v53 = vpop.eup %4521  ;;  %4265 = vmatpush3.msra.mxu0 %v4210_v62  ;;  %4268 = vmatprep.mubr.msk.f32.mxu0 %vm4566_vm1, %v5391_v52 }
 0x2e1   :  { %4266 = vmatprep.subr.mxu0 %v5391_v52  ;;  %v1336_v54 = vmul.f32 %v4522_v53, %v4514_v2 }
 0x2e2   :  { %4267 = vmatpush3.msra.mxu0 %v889_v9 }
 0x2e3   :  { %4262 = vmatmul.mubr.msk.f32.vlgmr.msra.gmra.mxu1 %vm1294_vm3, %v1336_v54  ;;  %4278 = vmatprep.subr.mxu0 %v5391_v52 }
 0x2e4   :  { %4272 = vmatpush3.msra.mxu1 %v5041_v61  ;;  %4275 = vmatprep.mubr.msk.f32.mxu1 %vm4566_vm1, %v5391_v52  ;;  %v5074_v61 = vld [vmem:[%s5365_s5] sm:$0xff] }
 0x2e5   :  { %4273 = vmatprep.subr.mxu1 %v5391_v52 }
 0x2e6   :  { %v4524_v55 = vpop.eup %4523  ;;  %4274 = vmatpush3.msra.mxu1 %v5043_v63  ;;  %v5081_v63 = vld [vmem:[%s5365_s5 + $0x8] sm:$0xff] }
 0x2e7   :  { %v1337_v62 = vmul.f32 %v4524_v55, %v4516_v50  ;;  %4283 = vmatprep.subr.mxu1 %v5391_v52 }
 0x2e9   :  { %4269 = vmatmul.mubr.msk.f32.vlgmr.msra.gmra.mxu0 %vm1294_vm3, %v1337_v62 }
 0x2ea   :  { %v4526_v9 = vpop.eup %4525  ;;  %4280 = vmatprep.mubr.msk.f32.mxu0 %vm4566_vm1, %v5391_v52  ;;  %4279 = vmatpush3.msra.mxu0 %v5074_v61 }
 0x2eb   :  { %v1338_v56 = vmul.f32 %v4526_v9, %v4518_v51  ;;  %4288 = vmatprep.subr.mxu0 %v5391_v52 }
 0x2ed   :  { %4276 = vmatmul.mubr.msk.f32.vlgmr.msra.gmra.mxu1 %vm1294_vm3, %v1338_v56 }
 0x2ee   :  { %4285 = vmatprep.mubr.msk.f32.mxu1 %vm4566_vm1, %v5391_v52  ;;  %4284 = vmatpush3.msra.mxu1 %v5081_v63 }
 0x2ef   :  { %4293 = vmatprep.subr.mxu1 %v5391_v52 }
 0x39f   :  { %v1408_v58 = vpop.f32.mrf.mxu0 }
 0x3a0   :  { %4281 = vmatmul.mubr.msk.f32.vlgmr.msra.gmra.mxu0 %vm977_vm2, %v1408_v58 }
 0x3a1   :  { %v4256_v2 = vpop.f32.mrf.mxu0  ;;  %4289 = vmatpush3.msra.mxu0 %v5088_v60  ;;  %4290 = vmatprep.mubr.msk.f32.mxu0 %vm4566_vm1, %v5391_v52 }
 0x3a2   :  { %4298 = vmatprep.subr.mxu0 %v5391_v52 }
 0x3a3   :  { %v1481_v50 = vpop.f32.mrf.mxu1 }
 0x3a4   :  { %4286 = vmatmul.mubr.msk.f32.vlgmr.msra.gmra.mxu1 %vm977_vm2, %v1481_v50 }
 0x3a5   :  { %v4263_v47 = vpop.f32.mrf.mxu1  ;;  %4294 = vmatpush3.msra.mxu1 %v5098_v49  ;;  %4295 = vmatprep.mubr.msk.f32.mxu1 %vm4566_vm1, %v5391_v52 }
 0x3a6   :  { %4309 = vmatprep.subr.mxu1 %v5391_v52 }
 0x3a9   :  { %v1554_v51 = vpop.f32.mrf.mxu0 }
 0x3aa   :  { %4291 = vmatmul.mubr.msk.f32.vlgmr.msra.gmra.mxu0 %vm977_vm2, %v1554_v51 }
 0x3ab   :  { %4299 = vmatpush3.msra.mxu0 %v4613_v0  ;;  %v4270_v26 = vpop.f32.mrf.mxu0  ;;  %4306 = vmatprep.mubr.msk.f32.mxu0 %vm4566_vm1, %v5391_v52  ;;  %v3847_v0 = vld [vmem:[%s5360_s0 + $0x8] sm:$0xff] }
 0x3ac   :  { %4300 = vmatprep.subr.mxu0 %v5391_v52 }
 0x3ad   :  { %4301 = vmatpush3.msra.mxu0 %v4625_v3  ;;  %v1627_v48 = vpop.f32.mrf.mxu1  ;;  %v5169_v3 = vld [vmem:[%s5361_s1 + $0x18] sm:$0xff] }
 0x3ae   :  { %4302 = vmatprep.subr.mxu0 %v5391_v52  ;;  %4296 = vmatmul.mubr.msk.f32.vlgmr.msra.gmra.mxu1 %vm977_vm2, %v1627_v48 }
 0x3af   :  { %4303 = vmatpush3.msra.mxu0 %v4639_v5  ;;  %4310 = vmatpush3.msra.mxu1 %v4618_v1  ;;  %v4277_v45 = vpop.f32.mrf.mxu1  ;;  %v5162_v1 = vld [vmem:[%s5361_s1 + $0x10] sm:$0xff] }
 0x3b0   :  { %4304 = vmatprep.subr.mxu0 %v5391_v52  ;;  %4311 = vmatprep.subr.mxu1 %v5391_v52  ;;  %v5393_v5 = vld [vmem:[#allocation5_spill] sm:$0xff] }
 0x3b1   :  { %4305 = vmatpush3.msra.mxu0 %v4653_v7  ;;  %4312 = vmatpush3.msra.mxu1 %v4630_v4  ;;  %v5392_v4 = vld [vmem:[#allocation6_spill] sm:$0xff]  ;;  %v5395_v7 = vld [vmem:[#allocation7_spill] sm:$0xff] }
 0x3b2   :  { %4313 = vmatprep.subr.mxu1 %v5391_v52  ;;  %4320 = vmatprep.subr.mxu0 %v5391_v52 }
 0x3b3   :  { %4307 = vmatmul.mubr.msk.f32.vlgmr.msra.gmra.mxu0 %vm83_vm0, %v3847_v0  ;;  %4314 = vmatpush3.msra.mxu1 %v4644_v6  ;;  %v5394_v6 = vld [vmem:[#allocation8_spill] sm:$0xff] }
 0x3b4   :  { %4321 = vmatpush3.msra.mxu0 %v4675_v10  ;;  %4315 = vmatprep.subr.mxu1 %v5391_v52  ;;  %v5397_v10 = vld [vmem:[#allocation9_spill] sm:$0xff] }
 0x3b5   :  { %4322 = vmatprep.subr.mxu0 %v5391_v52  ;;  %4316 = vmatpush3.msra.mxu1 %v4660_v8  ;;  %v5396_v8 = vld [vmem:[#allocation10_spill] sm:$0xff] }
 0x3b6   :  { %4317 = vmatprep.mubr.msk.f32.mxu1 %vm4566_vm1, %v5391_v52  ;;  %4323 = vmatpush3.msra.mxu0 %v4690_v12 }
 0x3b7   :  { %4318 = vmatmul.mubr.msk.f32.vlgmr.msra.gmra.mxu1 %vm83_vm0, %v3847_v0  ;;  %4324 = vmatprep.subr.mxu0 %v5391_v52 }
 0x3b8   :  { %4331 = vmatprep.subr.mxu1 %v5391_v52  ;;  %4325 = vmatpush3.msra.mxu0 %v4704_v14 }
 0x3b9   :  { %4332 = vmatpush3.msra.mxu1 %v4680_v11  ;;  %4326 = vmatprep.subr.mxu0 %v5391_v52  ;;  %v5398_v11 = vld [vmem:[#allocation11_spill] sm:$0xff] }
 0x3ba   :  { %4333 = vmatprep.subr.mxu1 %v5391_v52  ;;  %4327 = vmatpush3.msra.mxu0 %v4718_v16 }
 0x3bb   :  { %4334 = vmatpush3.msra.mxu1 %v4695_v13  ;;  %4328 = vmatprep.mubr.msk.f32.mxu0 %vm4566_vm1, %v5391_v52 }
 0x3bc   :  { %4335 = vmatprep.subr.mxu1 %v5391_v52  ;;  %4342 = vmatprep.subr.mxu0 %v4732_v18 }
 0x3bd   :  { %4329 = vmatmul.mubr.msk.f32.vlgmr.msra.gmra.mxu0 %vm83_vm0, %v3847_v0  ;;  %4336 = vmatpush3.msra.mxu1 %v4709_v15 }
 0x3be   :  { %4343 = vmatpush3.msra.mxu0 %v4732_v18  ;;  %4337 = vmatprep.subr.mxu1 %v5391_v52 }
 0x3bf   :  { %4344 = vmatprep.subr.mxu0 %v4750_v20  ;;  %4338 = vmatpush3.msra.mxu1 %v4725_v17 }
 0x3c0   :  { %4339 = vmatprep.mubr.msk.f32.mxu1 %vm4566_vm1, %v5391_v52  ;;  %4345 = vmatpush3.msra.mxu0 %v4750_v20 }
 0x3c1   :  { %4340 = vmatmul.mubr.msk.f32.vlgmr.msra.gmra.mxu1 %vm83_vm0, %v3847_v0  ;;  %4346 = vmatprep.subr.mxu0 %v4764_v22 }
 0x3c2   :  { %4353 = vmatprep.subr.mxu1 %v4740_v19  ;;  %4347 = vmatpush3.msra.mxu0 %v4764_v22 }
 0x3c3   :  { %4354 = vmatpush3.msra.mxu1 %v4740_v19  ;;  %4348 = vmatprep.subr.mxu0 %v4778_v24 }
 0x3c4   :  { %4355 = vmatprep.subr.mxu1 %v4755_v21  ;;  %4349 = vmatpush3.msra.mxu0 %v4778_v24  ;;  %v5270_v24 = vld [vmem:[%s5366_s6] ss:$0 sm:$0xff]  ;;  %s4567_s6 = smov [#allocation2]  }
 0x3c5   :  { %4350 = vmatprep.mubr.msk.f32.mxu0 %vm83_vm0, %v5162_v1  ;;  %4356 = vmatpush3.msra.mxu1 %v4755_v21  ;;  %s3795_s17 = sshll.u32 %s4567_s6, 4  ;;  %s3796_s17 = int_to_ptr.vmem [resolvable:$true] %s3795_s17 }
 0x3c6   :  { %4351 = vmatmul.mubr.msk.f32.vlgmr.msra.gmra.mxu0 %vm83_vm0, %v5169_v3  ;;  %4357 = vmatprep.subr.mxu1 %v4769_v23  ;;  %s4543_s18 = scalar_lea.vmem %s3796_s17, 256  ;;  %p4548_p1 = scmp.lt.s32.totalorder %s3796_s17, %s3796_s17 }
 0x3c7   :  { %4364 = vmatprep.subr.mxu0 %v4807_v28  ;;  %4358 = vmatpush3.msra.mxu1 %v4769_v23  ;;  %p4544_p0 = scmp.ne.s32.totalorder %s3796_s17, %s4543_s18  ;;  %p4549_p2 = scmp.lt.s32.totalorder %s4543_s18, %s4543_s18 }
 0x3c8   :  { %4365 = vmatpush3.msra.mxu0 %v4807_v28  ;;  %4359 = vmatprep.subr.mxu1 %v4783_v25 }
 0x3c9   :  { %4366 = vmatprep.subr.mxu0 %v4824_v30  ;;  %4360 = vmatpush3.msra.mxu1 %v4783_v25  ;;  %p4550_p3 = por %p4549_p2, %p4548_p1 }
 0x3ca   :  { %4361 = vmatprep.mubr.msk.f32.mxu1 %vm83_vm0, %v5162_v1  ;;  %4367 = vmatpush3.msra.mxu0 %v4824_v30 }
 0x3cb   :  { %4362 = vmatmul.mubr.msk.f32.vlgmr.msra.gmra.mxu1 %vm83_vm0, %v5169_v3  ;;  %4368 = vmatprep.subr.mxu0 %v4838_v32  ;;  %p4551_p4 = pnand %p4550_p3, %p4544_p0 }
 0x3cc   :  { %4375 = vmatprep.subr.mxu1 %v4812_v29  ;;  %4369 = vmatpush3.msra.mxu0 %v4838_v32 }
 0x3cd   :  { %4376 = vmatpush3.msra.mxu1 %v4812_v29  ;;  %4370 = vmatprep.subr.mxu0 %v4852_v34 }
 0x3ce   :  { %4377 = vmatprep.subr.mxu1 %v4829_v31  ;;  %4371 = vmatpush3.msra.mxu0 %v4852_v34 }
 0x3cf   :  { %4372 = vmatprep.mubr.msk.f32.mxu0 %vm83_vm0, %v5162_v1  ;;  %4378 = vmatpush3.msra.mxu1 %v4829_v31 }
 0x3d0   :  { %4373 = vmatmul.mubr.msk.f32.vlgmr.msra.gmra.mxu0 %vm83_vm0, %v5169_v3  ;;  %4379 = vmatprep.subr.mxu1 %v4843_v33 }
 0x3d1   :  { %4380 = vmatpush3.msra.mxu1 %v4843_v33  ;;  %4383 = vmatprep.mubr.msk.f32.mxu1 %vm83_vm0, %v5162_v1 }
 0x3d2   :  { %4381 = vmatprep.subr.mxu1 %v4857_v35  ;;  %4386 = vmatprep.subr.mxu0 %v4871_v36 }
 0x3d3   :  { %4382 = vmatpush3.msra.mxu1 %v4857_v35  ;;  %4387 = vmatpush3.msra.mxu0 %v4871_v36 }
 0x3d4   :  { %4384 = vmatmul.mubr.msk.f32.vlgmr.msra.gmra.mxu1 %vm83_vm0, %v5169_v3  ;;  %4388 = vmatprep.subr.mxu0 %v4894_v38 }
 0x3d5   :  { %4389 = vmatpush3.msra.mxu0 %v4894_v38  ;;  %4397 = vmatprep.subr.mxu1 %v4889_v37 }
 0x3d6   :  { %4390 = vmatprep.subr.mxu0 %v4908_v40  ;;  %4398 = vmatpush3.msra.mxu1 %v4889_v37 }
 0x3d7   :  { %4391 = vmatpush3.msra.mxu0 %v4908_v40  ;;  %4399 = vmatprep.subr.mxu1 %v4901_v39 }
 0x3d8   :  { %4392 = vmatprep.subr.mxu0 %v4920_v42  ;;  %4400 = vmatpush3.msra.mxu1 %v4901_v39 }
 0x3d9   :  { %4393 = vmatpush3.msra.mxu0 %v4920_v42  ;;  %4401 = vmatprep.subr.mxu1 %v4913_v41 }
 0x3da   :  { %4394 = vmatprep.mubr.msk.f32.mxu0 %vm83_vm0, %v5162_v1  ;;  %4402 = vmatpush3.msra.mxu1 %v4913_v41 }
 0x3db   :  { %4408 = vmatprep.subr.mxu0 %v4934_v44  ;;  %4395 = vmatmul.mubr.msk.f32.vlgmr.msra.gmra.mxu0 %vm83_vm0, %v5169_v3 }
 0x3dc   :  { %4403 = vmatprep.subr.mxu1 %v4927_v43  ;;  %4409 = vmatpush3.msra.mxu0 %v4934_v44 }
 0x3dd   :  { %4404 = vmatpush3.msra.mxu1 %v4927_v43  ;;  %4405 = vmatprep.mubr.msk.f32.mxu1 %vm83_vm0, %v5162_v1 }
 0x3de   :  { %4410 = vmatprep.subr.mxu0 %v5392_v4  ;;  %4406 = vmatmul.mubr.msk.f32.vlgmr.msra.gmra.mxu1 %vm83_vm0, %v5169_v3 }
 0x3df   :  { %4411 = vmatpush3.msra.mxu0 %v5392_v4  ;;  %4419 = vmatprep.subr.mxu1 %v5393_v5 }
 0x3e0   :  { %4412 = vmatprep.subr.mxu0 %v5394_v6  ;;  %4420 = vmatpush3.msra.mxu1 %v5393_v5 }
 0x3e1   :  { %4413 = vmatpush3.msra.mxu0 %v5394_v6  ;;  %4421 = vmatprep.subr.mxu1 %v5395_v7 }
 0x3e2   :  { %4414 = vmatprep.subr.mxu0 %v5396_v8  ;;  %4422 = vmatpush3.msra.mxu1 %v5395_v7 }
 0x3e3   :  { %4415 = vmatpush3.msra.mxu0 %v5396_v8  ;;  %4423 = vmatprep.subr.mxu1 %v5397_v10 }
 0x3e4   :  { %4416 = vmatprep.mubr.msk.f32.mxu0 %vm83_vm0, %v5162_v1  ;;  %4424 = vmatpush3.msra.mxu1 %v5397_v10 }
 0x3e5   :  { %4430 = vmatprep.subr.mxu0 %v5391_v52  ;;  %4417 = vmatmul.mubr.msk.f32.vlgmr.msra.gmra.mxu0 %vm83_vm0, %v5169_v3 }
 0x3e6   :  { %4425 = vmatprep.subr.mxu1 %v5398_v11  ;;  %4427 = vmatprep.mubr.msk.f32.mxu1 %vm83_vm0, %v5162_v1 }
 0x3e7   :  { %4426 = vmatpush3.msra.mxu1 %v5398_v11  ;;  %4434 = vmatprep.mubr.msk.f32.mxu0 %vm4566_vm1, %v5391_v52 }
 0x3e8   :  { %4428 = vmatmul.mubr.msk.f32.vlgmr.msra.gmra.mxu1 %vm83_vm0, %v5169_v3  ;;  %4437 = vmatprep.subr.mxu1 %v5391_v52 }
 0x3e9   :  { %4441 = vmatprep.mubr.msk.f32.mxu1 %vm4566_vm1, %v5391_v52 }
 0x460   :  { %v1700_v12 = vpop.f32.mrf.mxu0 }
 0x461   :  { %v1923_v18 = vsel %vm83_vm0, %v1700_v12, 0.0 }
 0x462   :  { %v4282_v13 = vpop.f32.mrf.mxu0 }
 0x464   :  { %v1773_v14 = vpop.f32.mrf.mxu1 }
 0x465   :  { %v1924_v16 = vsel %vm83_vm0, %v1773_v14, 0.0 }
 0x466   :  { %v4287_v15 = vpop.f32.mrf.mxu1  ;;  %v1925_v20 = vadd.f32 %v1924_v16, %v1923_v18 }
 0x46a   :  { %v1846_v17 = vpop.f32.mrf.mxu0 }
 0x46b   :  { %v1926_v19 = vsel %vm83_vm0, %v1846_v17, 0.0 }
 0x46c   :  { %v4292_v21 = vpop.f32.mrf.mxu0  ;;  %v1927_v22 = vadd.f32 %v1926_v19, %v1925_v20 }
 0x46e   :  { %v1919_v23 = vpop.f32.mrf.mxu1 }
 0x46f   :  { %v1928_v25 = vsel %vm83_vm0, %v1919_v23, 0.0 }
 0x470   :  { %v1929_v28 = vadd.f32 %v1928_v25, %v1927_v22  ;;  %v4297_v29 = vpop.f32.mrf.mxu1 }
 0x472   :  { %v1936_v30 = vadd.f32 %v5270_v24, %v1929_v28 }
 0x473   :  { %v2012_v31 = vpop.f32.mrf.mxu0 }
 0x474   :  { %1937 = vst.msk [vmem:[#allocation2] sm:$0xff] %vm83_vm0, %v1936_v30  ;;  %v2832_v42 = vmul.f32 0.35355338, %v2012_v31 }
 0x475   :  { %v4308_v32 = vpop.f32.mrf.mxu0 }
 0x477   :  { %v2082_v33 = vpop.f32.mrf.mxu1 }
 0x478   :  { %v2833_v46 = vmul.f32 0.35355338, %v2082_v33 }
 0x479   :  { %v4319_v34 = vpop.f32.mrf.mxu1 }
 0x47d   :  { %v2152_v35 = vpop.f32.mrf.mxu0 }
 0x47e   :  { %v2834_v59 = vmul.f32 0.35355338, %v2152_v35 }
 0x47f   :  { %v4330_v36 = vpop.f32.mrf.mxu0 }
 0x481   :  { %v2222_v37 = vpop.f32.mrf.mxu1 }
 0x482   :  { %v2835_v54 = vmul.f32 0.35355338, %v2222_v37 }
 0x483   :  { %v4341_v38 = vpop.f32.mrf.mxu1 }
 0x486   :  { %v4352_v39 = vpop.f32.mrf.mxu0 }
 0x487   :  { %4431 = vmatpush3.xpose.msk.msra.mxu0 %vm977_vm2, %v4352_v39 }
 0x488   :  { %4432 = vmatprep.subr.mxu0 %v5391_v52  ;;  %v2298_v40 = vpop.f32.mrf.mxu0 }
 0x48b   :  { %v4363_v41 = vpop.f32.mrf.mxu1  ;;  %4433 = vmatpush3.xpose.msk.msra.mxu0 %vm977_vm2, %v2298_v40 }
 0x48c   :  { %4438 = vmatpush3.xpose.msk.msra.mxu1 %vm977_vm2, %v4363_v41  ;;  %4444 = vmatprep.subr.mxu0 %v5391_v52 }
 0x48d   :  { %4439 = vmatprep.subr.mxu1 %v5391_v52  ;;  %v2373_v43 = vpop.f32.mrf.mxu1 }
 0x48e   :  { %4435 = vmatmul.mubr.msk.f32.vlgmr.msra.gmra.mxu0 %vm977_vm2, %v2832_v42 }
 0x48f   :  { %4448 = vmatprep.mubr.msk.f32.mxu0 %vm4566_vm1, %v5391_v52 }
 0x490   :  { %v4374_v44 = vpop.f32.mrf.mxu0  ;;  %4440 = vmatpush3.xpose.msk.msra.mxu1 %vm977_vm2, %v2373_v43 }
 0x491   :  { %4445 = vmatpush3.xpose.msk.msra.mxu0 %vm977_vm2, %v4374_v44  ;;  %4451 = vmatprep.subr.mxu1 %v5391_v52 }
 0x492   :  { %4446 = vmatprep.subr.mxu0 %v5391_v52  ;;  %v2448_v27 = vpop.f32.mrf.mxu0 }
 0x493   :  { %4442 = vmatmul.mubr.msk.f32.vlgmr.msra.gmra.mxu1 %vm977_vm2, %v2833_v46 }
 0x494   :  { %v4385_v57 = vpop.f32.mrf.mxu1  ;;  %4455 = vmatprep.mubr.msk.f32.mxu1 %vm4566_vm1, %v5391_v52 }
 0x495   :  { %4447 = vmatpush3.xpose.msk.msra.mxu0 %vm977_vm2, %v2448_v27  ;;  %4452 = vmatpush3.xpose.msk.msra.mxu1 %vm977_vm2, %v4385_v57 }
 0x496   :  { %4453 = vmatprep.subr.mxu1 %v5391_v52  ;;  %4458 = vmatprep.subr.mxu0 %v5391_v52  ;;  %v2523_v53 = vpop.f32.mrf.mxu1 }
 0x498   :  { %4449 = vmatmul.mubr.msk.f32.vlgmr.msra.gmra.mxu0 %vm977_vm2, %v2834_v59 }
 0x499   :  { %4454 = vmatpush3.xpose.msk.msra.mxu1 %vm977_vm2, %v2523_v53  ;;  %4462 = vmatprep.mubr.msk.f32.mxu0 %vm4566_vm1, %v5391_v52 }
 0x49a   :  { %4465 = vmatprep.subr.mxu1 %v5391_v52 }
 0x49b   :  { %v4396_v55 = vpop.f32.mrf.mxu0 }
 0x49c   :  { %4456 = vmatmul.mubr.msk.f32.vlgmr.msra.gmra.mxu1 %vm977_vm2, %v2835_v54  ;;  %4459 = vmatpush3.msra.mxu0 %v4396_v55 }
 0x49d   :  { %v2598_v62 = vpop.f32.mrf.mxu0  ;;  %4460 = vmatprep.subr.mxu0 %v5391_v52  ;;  %4469 = vmatprep.mubr.msk.f32.mxu1 %vm4566_vm1, %v5391_v52 }
 0x49e   :  { %v4407_v9 = vpop.f32.mrf.mxu1  ;;  %4461 = vmatpush3.msra.mxu0 %v2598_v62 }
 0x49f   :  { %4466 = vmatpush3.msra.mxu1 %v4407_v9  ;;  %4472 = vmatprep.subr.mxu0 %v5391_v52 }
 0x4a0   :  { %v2673_v56 = vpop.f32.mrf.mxu1  ;;  %4467 = vmatprep.subr.mxu1 %v5391_v52 }
 0x4a1   :  { %4468 = vmatpush3.msra.mxu1 %v2673_v56 }
 0x4a2   :  { %4479 = vmatprep.subr.mxu1 %v5391_v52 }
 0x4a5   :  { %v4418_v58 = vpop.f32.mrf.mxu0 }
 0x4a7   :  { %v2748_v2 = vpop.f32.mrf.mxu0 }
 0x4a8   :  { %v5307_v50 = vpop.f32.mrf.mxu1 }
 0x4aa   :  { %v5310_v48 = vpop.f32.mrf.mxu1 }
 0x54e   :  { %v2911_v47 = vpop.f32.mrf.mxu0 }
 0x54f   :  { %v3152_v51 = vsel %vm1294_vm3, %v2911_v47, -inf }
 0x550   :  { %3153 = vmax.xlane.f32.xlu0 %v3152_v51  ;;  %v4436_v26 = vpop.f32.mrf.mxu0 }
 0x553   :  { %v2990_v45 = vpop.f32.mrf.mxu1 }
 0x554   :  { %v3155_v0 = vsel %vm1294_vm3, %v2990_v45, -inf }
 0x555   :  { %3156 = vmax.xlane.f32.xlu1 %v3155_v0  ;;  %v4443_v1 = vpop.f32.mrf.mxu1 }
 0x558   :  { %v3069_v3 = vpop.f32.mrf.mxu0 }
 0x559   :  { %v3158_v4 = vsel %vm1294_vm3, %v3069_v3, -inf }
 0x55a   :  { %3159 = vmax.xlane.f32.xlu0 %v3158_v4  ;;  %v4450_v5 = vpop.f32.mrf.mxu0 }
 0x55c   :  { %v3148_v6 = vpop.f32.mrf.mxu1 }
 0x55d   :  { %v3161_v7 = vsel %vm1294_vm3, %v3148_v6, -inf }
 0x55e   :  { %3162 = vmax.xlane.f32.xlu1 %v3161_v7  ;;  %v4457_v8 = vpop.f32.mrf.mxu1 }
 0x5d9   :  { %v3154_v10 = vpop.xlane.xlu0 %3153 }
 0x5da   :  { %v3164_v11 = vsub.f32 %v2911_v47, %v3154_v10 }
 0x5dc   :  { %v3168_v12 = vmul.f32 1.442695, %v3164_v11 }
 0x5de   :  { %4527 = vpow2.f32 %v3168_v12  ;;  %v3157_v13 = vpop.xlane.xlu1 %3156 }
 0x5df   :  { %v3165_v14 = vsub.f32 %v2990_v45, %v3157_v13 }
 0x5e1   :  { %v3170_v15 = vmul.f32 1.442695, %v3165_v14 }
 0x5e3   :  { %4529 = vpow2.f32 %v3170_v15  ;;  %v3160_v16 = vpop.xlane.xlu0 %3159 }
 0x5e4   :  { %v3166_v17 = vsub.f32 %v3069_v3, %v3160_v16 }
 0x5e6   :  { %v3172_v18 = vmul.f32 1.442695, %v3166_v17 }
 0x5e7   :  { %v3163_v19 = vpop.xlane.xlu1 %3162 }
 0x5e8   :  { %4531 = vpow2.f32 %v3172_v18  ;;  %v3167_v20 = vsub.f32 %v3148_v6, %v3163_v19 }
 0x5ea   :  { %v3174_v21 = vmul.f32 1.442695, %v3167_v20 }
 0x5eb   :  { %v4528_v22 = vpop.eup %4527 }
 0x5ec   :  { %4533 = vpow2.f32 %v3174_v21  ;;  %v3176_v23 = vsel %vm1294_vm3, %v4528_v22, 0.0 }
 0x5ed   :  { %3177 = vadd.xlane.f32.xlu0 %v3176_v23 }
 0x5f0   :  { %v4530_v25 = vpop.eup %4529 }
 0x5f1   :  { %v3179_v28 = vsel %vm1294_vm3, %v4530_v25, 0.0 }
 0x5f2   :  { %3180 = vadd.xlane.f32.xlu1 %v3179_v28 }
 0x5f5   :  { %v4532_v29 = vpop.eup %4531 }
 0x5f6   :  { %v3182_v30 = vsel %vm1294_vm3, %v4532_v29, 0.0 }
 0x5f7   :  { %3183 = vadd.xlane.f32.xlu0 %v3182_v30 }
 0x5f9   :  { %v4534_v31 = vpop.eup %4533 }
 0x5fa   :  { %v3185_v32 = vsel %vm1294_vm3, %v4534_v31, 0.0 }
 0x5fb   :  { %3186 = vadd.xlane.f32.xlu1 %v3185_v32 }
 0x676   :  { %v3178_v33 = vpop.xlane.xlu0 %3177 }
 0x677   :  { %4535 = vrcp.f32 %v3178_v33 }
 0x67b   :  { %v3181_v34 = vpop.xlane.xlu1 %3180 }
 0x67c   :  { %4537 = vrcp.f32 %v3181_v34 }
 0x680   :  { %v3184_v35 = vpop.xlane.xlu0 %3183 }
 0x681   :  { %4539 = vrcp.f32 %v3184_v35 }
 0x684   :  { %v4536_v36 = vpop.eup %4535  ;;  %v3187_v37 = vpop.xlane.xlu1 %3186 }
 0x685   :  { %4541 = vrcp.f32 %v3187_v37  ;;  %v3192_v38 = vmul.f32 %v4536_v36, %v4528_v22 }
 0x687   :  { %4463 = vmatmul.mubr.msk.f32.vlgmr.msra.gmra.mxu0 %vm1294_vm3, %v3192_v38 }
 0x688   :  { %4473 = vmatpush3.msra.mxu0 %v4418_v58  ;;  %4476 = vmatprep.mubr.msk.f32.mxu0 %vm4566_vm1, %v5391_v52 }
 0x689   :  { %v4538_v39 = vpop.eup %4537  ;;  %4474 = vmatprep.subr.mxu0 %v5391_v52 }
 0x68a   :  { %4475 = vmatpush3.msra.mxu0 %v2748_v2  ;;  %v3193_v40 = vmul.f32 %v4538_v39, %v4530_v25 }
 0x68b   :  { %4486 = vmatprep.subr.mxu0 %v5391_v52 }
 0x68c   :  { %4470 = vmatmul.mubr.msk.f32.vlgmr.msra.gmra.mxu1 %vm1294_vm3, %v3193_v40 }
 0x68d   :  { %4480 = vmatpush3.msra.mxu1 %v5307_v50  ;;  %4483 = vmatprep.mubr.msk.f32.mxu1 %vm4566_vm1, %v5391_v52 }
 0x68e   :  { %v4540_v41 = vpop.eup %4539  ;;  %4481 = vmatprep.subr.mxu1 %v5391_v52 }
 0x68f   :  { %4482 = vmatpush3.msra.mxu1 %v5310_v48  ;;  %v3194_v42 = vmul.f32 %v4540_v41, %v4532_v29 }
 0x690   :  { %4491 = vmatprep.subr.mxu1 %v5391_v52 }
 0x691   :  { %4477 = vmatmul.mubr.msk.f32.vlgmr.msra.gmra.mxu0 %vm1294_vm3, %v3194_v42 }
 0x692   :  { %v4542_v43 = vpop.eup %4541  ;;  %4487 = vmatpush3.msra.mxu0 %v5074_v61  ;;  %4488 = vmatprep.mubr.msk.f32.mxu0 %vm4566_vm1, %v5391_v52 }
 0x693   :  { %v3195_v44 = vmul.f32 %v4542_v43, %v4534_v31  ;;  %4496 = vmatprep.subr.mxu0 %v5391_v52 }
 0x695   :  { %4484 = vmatmul.mubr.msk.f32.vlgmr.msra.gmra.mxu1 %vm1294_vm3, %v3195_v44 }
 0x696   :  { %4492 = vmatpush3.msra.mxu1 %v5081_v63  ;;  %4493 = vmatprep.mubr.msk.f32.mxu1 %vm4566_vm1, %v5391_v52 }
 0x697   :  { %4501 = vmatprep.subr.mxu1 %v5391_v52 }
 0x747   :  { %v3265_v46 = vpop.f32.mrf.mxu0 }
 0x748   :  { %4489 = vmatmul.mubr.msk.f32.vlgmr.msra.gmra.mxu0 %vm977_vm2, %v3265_v46 }
 0x749   :  { %v4464_v27 = vpop.f32.mrf.mxu0  ;;  %4497 = vmatpush3.msra.mxu0 %v5088_v60  ;;  %4498 = vmatprep.mubr.msk.f32.mxu0 %vm4566_vm1, %v5391_v52 }
 0x74c   :  { %v3338_v61 = vpop.f32.mrf.mxu1 }
 0x74d   :  { %4494 = vmatmul.mubr.msk.f32.vlgmr.msra.gmra.mxu1 %vm977_vm2, %v3338_v61 }
 0x74e   :  { %v4471_v57 = vpop.f32.mrf.mxu1  ;;  %4502 = vmatpush3.msra.mxu1 %v5098_v49  ;;  %4503 = vmatprep.mubr.msk.f32.mxu1 %vm4566_vm1, %v5391_v52 }
 0x751   :  { %v3411_v63 = vpop.f32.mrf.mxu0 }
 0x752   :  { %4499 = vmatmul.mubr.msk.f32.vlgmr.msra.gmra.mxu0 %vm977_vm2, %v3411_v63 }
 0x753   :  { %v4478_v59 = vpop.f32.mrf.mxu0 }
 0x755   :  { %v3484_v53 = vpop.f32.mrf.mxu1 }
 0x756   :  { %4504 = vmatmul.mubr.msk.f32.vlgmr.msra.gmra.mxu1 %vm977_vm2, %v3484_v53 }
 0x757   :  { %v4485_v60 = vpop.f32.mrf.mxu1 }
 0x808   :  { %v3557_v54 = vpop.f32.mrf.mxu0 }
 0x809   :  { %v3780_v49 = vsel %vm83_vm0, %v3557_v54, 0.0 }
 0x80a   :  { %v4490_v55 = vpop.f32.mrf.mxu0 }
 0x80d   :  { %v3630_v62 = vpop.f32.mrf.mxu1 }
 0x80e   :  { %v3781_v56 = vsel %vm83_vm0, %v3630_v62, 0.0 }
 0x80f   :  { %v4495_v9 = vpop.f32.mrf.mxu1  ;;  %v3782_v52 = vadd.f32 %v3781_v56, %v3780_v49 }
 0x812   :  { %v3703_v58 = vpop.f32.mrf.mxu0 }
 0x813   :  { %v3783_v2 = vsel %vm83_vm0, %v3703_v58, 0.0 }
 0x814   :  { %v4500_v50 = vpop.f32.mrf.mxu0  ;;  %v3784_v47 = vadd.f32 %v3783_v2, %v3782_v52 }
 0x816   :  { %v3776_v51 = vpop.f32.mrf.mxu1 }
 0x817   :  { %v3785_v26 = vsel %vm83_vm0, %v3776_v51, 0.0 }
 0x818   :  { %v3786_v48 = vadd.f32 %v3785_v26, %v3784_v47  ;;  %v4505_v45 = vpop.f32.mrf.mxu1 }
 0x81a   :  { %v3787_v0 = vadd.f32 %v5270_v24, %v3786_v48 }
 0x81c   :  { %3789 = vst.msk [vmem:[#allocation2 + $0x8] sm:$0xff] %vm83_vm0, %v3787_v0 }
 0x81d   :  { %4554 = shalt.err (!%p4551_p4)
}
 0x81e   :  { %s4568_s19 = smov 128   ;;  %s4569_s20 = smov 8  }
 0x81f   :  { %3801 = dma.vmem_to_hbm [thread:$0]  %s3796_s17, 256, %s5367_s7, [#allocation3], %s4568_s19, %s4568_s19, %s4569_s20  }
 0x820   :  { %4563 = dma.done.wait [#allocation3], 256  }
 0x821   :  { %4564 = vsyncadd [#allocation3], 4294967040 }
 0x822   :  { %3805 = vsyncpa [#allocation3], 1 }

</bundles_post_ra>
